<compile_context>
chip_gen: v7x
topology: tpu7x:2x2x1
jax: 0.10.0
libtpu: 0.0.40
codegen_flags: <defaults>
</compile_context>

<pallas_src>
import functools

import jax
import jax.numpy as jnp
from jax.experimental import pallas as pl
from jax.experimental.pallas import tpu as pltpu  # noqa: F401  (TPU backend)

MAX_TOKEN_ID = 93821
EMBED_DIM = 32
HIDDEN = 32


def lstm_fc_kernel(x_ref, wih_ref, whh_ref, b_ref, wfc_ref, bfc_ref, out_ref,
                   *, B, T, H):
    """Single-invocation LSTM + FC + sigmoid.

    x_ref  : (T*B, H)  time-major embeddings (row t*B + b == timestep t, batch b)
    wih_ref: (H, 4H)   W_ih^T
    whh_ref: (H, 4H)   W_hh^T
    b_ref  : (1, 4H)   b_ih + b_hh
    wfc_ref: (1, H)    fc weight (row vector)
    bfc_ref: (1, 1)    fc bias
    out_ref: (B, 1)    sigmoid(fc(h_T))
    """
    # --- Hoisted input projection: one GEMM over all timesteps (MXU). ---
    xproj = (jnp.dot(x_ref[...], wih_ref[...],
                     preferred_element_type=jnp.float32)
             + b_ref[...])                                    # (T*B, 4H)

    whh = whh_ref[...]                                        # (H, 4H)

    h = jnp.zeros((B, H), jnp.float32)
    c = jnp.zeros((B, H), jnp.float32)

    # --- Fully-unrolled recurrence; h/c stay in vregs (T is small & static). ---
    for t in range(T):
        gates = xproj[t * B:(t + 1) * B, :] + jnp.dot(
            h, whh, preferred_element_type=jnp.float32)        # (B, 4H)

        # Full-width nonlinearities (2 EUP passes), slice gates afterwards.
        sig = jax.nn.sigmoid(gates)
        tnh = jnp.tanh(gates)
        i_g = sig[:, 0 * H:1 * H]
        f_g = sig[:, 1 * H:2 * H]
        g_g = tnh[:, 2 * H:3 * H]
        o_g = sig[:, 3 * H:4 * H]

        c = f_g * c + i_g * g_g
        h = o_g * jnp.tanh(c)

    # --- Final FC: VPU multiply + lane reduction (avoid an N=1 MXU matmul). ---
    logits = jnp.sum(h * wfc_ref[...], axis=-1, keepdims=True) + bfc_ref[...]
    out_ref[...] = jax.nn.sigmoid(logits)


def model_forward(tokens, params):
    """tokens: (B, T) int32; returns (B, 1) float32 == sigmoid(fc(lstm(emb(x))[:, -1, :]))."""
    B, T = tokens.shape
    H = EMBED_DIM

    # Embedding gather (plain-JAX glue) directly in time-major row order:
    # row t*B + b holds the embedding of tokens[b, t]. Avoids transposing the
    # float activations on the host side.
    flat_ids = tokens.T.reshape(-1)                            # (T*B,) time-major
    x2d = jnp.take(params["embedding"], flat_ids, axis=0).astype(jnp.float32)  # (T*B, H)

    wih_t = params["w_ih"].T                                   # (H, 4H)
    whh_t = params["w_hh"].T                                   # (H, 4H)
    bias = (params["b_ih"] + params["b_hh"]).reshape(1, 4 * H) # (1, 4H)
    wfc_row = params["w_fc"].reshape(1, H)                     # (1, H)
    bfc = params["b_fc"].reshape(1, 1)                         # (1, 1)

    kernel = functools.partial(lstm_fc_kernel, B=B, T=T, H=H)

    out = pl.pallas_call(
        kernel,
        out_shape=jax.ShapeDtypeStruct((B, 1), jnp.float32),
        in_specs=[
            pl.BlockSpec((T * B, H), lambda: (0, 0)),          # time-major embeddings
            pl.BlockSpec((H, 4 * H), lambda: (0, 0)),          # W_ih^T
            pl.BlockSpec((H, 4 * H), lambda: (0, 0)),          # W_hh^T
            pl.BlockSpec((1, 4 * H), lambda: (0, 0)),          # bias
            pl.BlockSpec((1, H), lambda: (0, 0)),              # fc weight row
            pl.BlockSpec((1, 1), lambda: (0, 0)),              # fc bias
        ],
        out_specs=pl.BlockSpec((B, 1), lambda: (0, 0)),
    )(x2d, wih_t, whh_t, bias, wfc_row, bfc)
    return out


def init_params(key):
    ks = jax.random.split(key, 6)
    scale = 0.1
    return {
        "embedding": scale * jax.random.normal(
            ks[0], (MAX_TOKEN_ID + 1, EMBED_DIM), jnp.float32),
        "w_ih": scale * jax.random.normal(ks[1], (4 * HIDDEN, EMBED_DIM), jnp.float32),
        "w_hh": scale * jax.random.normal(ks[2], (4 * HIDDEN, HIDDEN), jnp.float32),
        "b_ih": scale * jax.random.normal(ks[3], (4 * HIDDEN,), jnp.float32),
        "b_hh": scale * jax.random.normal(ks[4], (4 * HIDDEN,), jnp.float32),
        "w_fc": scale * jax.random.normal(ks[5], (1, HIDDEN), jnp.float32),
        "b_fc": jnp.zeros((1,), jnp.float32),
    }


def reference_forward(tokens, params):
    """Pure-JAX reference matching PyTorch LSTM gate order [i, f, g, o]."""
    emb = jnp.take(params["embedding"], tokens, axis=0)        # (B, T, H)
    B, T, H = emb.shape
    h = jnp.zeros((B, H), jnp.float32)
    c = jnp.zeros((B, H), jnp.float32)
    wih_t, whh_t = params["w_ih"].T, params["w_hh"].T
    b = params["b_ih"] + params["b_hh"]
    for t in range(T):
        g = emb[:, t, :] @ wih_t + h @ whh_t + b
        i_g = jax.nn.sigmoid(g[:, 0 * H:1 * H])
        f_g = jax.nn.sigmoid(g[:, 1 * H:2 * H])
        g_g = jnp.tanh(g[:, 2 * H:3 * H])
        o_g = jax.nn.sigmoid(g[:, 3 * H:4 * H])
        c = f_g * c + i_g * g_g
        h = o_g * jnp.tanh(c)
    return jax.nn.sigmoid(h @ params["w_fc"].T + params["b_fc"])


if __name__ == "__main__":
    key = jax.random.PRNGKey(0)
    params = init_params(key)

    B, T = 2, 8
    tokens = jax.random.randint(jax.random.PRNGKey(1), (B, T), 0,
                                MAX_TOKEN_ID + 1, dtype=jnp.int32)

    out = model_forward(tokens, params)
    out = jax.block_until_ready(out)

    ref = reference_forward(tokens, params)
    assert out.shape == (B, 1)
    assert jnp.allclose(out, ref, rtol=1e-4, atol=1e-4), (out, ref)

    print("KERNEL_OK")
</pallas_src>

<mosaic_0001>
module attributes {stable_mosaic.version = 11 : i64} {
  func.func @lstm_fc_kernel(%arg0: memref<16x32xf32, #tpu.memory_space<vmem>>, %arg1: memref<32x128xf32, #tpu.memory_space<vmem>>, %arg2: memref<32x128xf32, #tpu.memory_space<vmem>>, %arg3: memref<1x128xf32, #tpu.memory_space<vmem>>, %arg4: memref<1x32xf32, #tpu.memory_space<vmem>>, %arg5: memref<1x1xf32, #tpu.memory_space<vmem>>, %arg6: memref<2x1xf32, #tpu.memory_space<vmem>>) attributes {dimension_semantics = [], scalar_prefetch = 0 : i64, scratch_operands = 0 : i64, tpu.core_type = #tpu.core_type<tc>} {
    %c0 = arith.constant 0 : index
    %c0_0 = arith.constant 0 : index
    %0 = vector.load %arg0[%c0, %c0_0] : memref<16x32xf32, #tpu.memory_space<vmem>>, vector<16x32xf32>
    %c0_1 = arith.constant 0 : index
    %c0_2 = arith.constant 0 : index
    %1 = vector.load %arg1[%c0_1, %c0_2] : memref<32x128xf32, #tpu.memory_space<vmem>>, vector<32x128xf32>
    %cst = arith.constant dense<0.000000e+00> : vector<16x128xf32>
    %2 = tpu.matmul %0, %1, %cst {dimension_numbers = #tpu.dot_dimension_numbers<[1], [0], [0], [1], [0, 0, 1, 1], [], []>} : vector<16x32xf32>, vector<32x128xf32>, vector<16x128xf32> -> vector<16x128xf32>
    %c0_3 = arith.constant 0 : index
    %c0_4 = arith.constant 0 : index
    %3 = vector.load %arg3[%c0_3, %c0_4] : memref<1x128xf32, #tpu.memory_space<vmem>>, vector<1x128xf32>
    %4 = vector.broadcast %3 : vector<1x128xf32> to vector<16x128xf32>
    %5 = arith.addf %2, %4 : vector<16x128xf32>
    %c0_5 = arith.constant 0 : index
    %c0_6 = arith.constant 0 : index
    %6 = vector.load %arg2[%c0_5, %c0_6] : memref<32x128xf32, #tpu.memory_space<vmem>>, vector<32x128xf32>
    %cst_7 = arith.constant 0.000000e+00 : f32
    %7 = vector.broadcast %cst_7 : f32 to vector<2x32xf32>
    %cst_8 = arith.constant 0.000000e+00 : f32
    %8 = vector.broadcast %cst_8 : f32 to vector<2x32xf32>
    %9 = vector.extract_strided_slice %5 {offsets = [0, 0], sizes = [2, 128], strides = [1, 1]} : vector<16x128xf32> to vector<2x128xf32>
    %cst_9 = arith.constant dense<0.000000e+00> : vector<2x128xf32>
    %10 = tpu.matmul %7, %6, %cst_9 {dimension_numbers = #tpu.dot_dimension_numbers<[1], [0], [0], [1], [0, 0, 1, 1], [], []>} : vector<2x32xf32>, vector<32x128xf32>, vector<2x128xf32> -> vector<2x128xf32>
    %11 = arith.addf %9, %10 : vector<2x128xf32>
    %12 = arith.negf %11 : vector<2x128xf32>
    %13 = math.exp %12 : vector<2x128xf32>
    %cst_10 = arith.constant 1.000000e+00 : f32
    %14 = vector.broadcast %cst_10 : f32 to vector<2x128xf32>
    %15 = arith.addf %14, %13 : vector<2x128xf32>
    %16 = arith.divf %14, %15 : vector<2x128xf32>
    %17 = math.tanh %11 : vector<2x128xf32>
    %18 = vector.extract_strided_slice %16 {offsets = [0, 0], sizes = [2, 32], strides = [1, 1]} : vector<2x128xf32> to vector<2x32xf32>
    %19 = vector.extract_strided_slice %16 {offsets = [0, 32], sizes = [2, 32], strides = [1, 1]} : vector<2x128xf32> to vector<2x32xf32>
    %20 = vector.extract_strided_slice %17 {offsets = [0, 64], sizes = [2, 32], strides = [1, 1]} : vector<2x128xf32> to vector<2x32xf32>
    %21 = vector.extract_strided_slice %16 {offsets = [0, 96], sizes = [2, 32], strides = [1, 1]} : vector<2x128xf32> to vector<2x32xf32>
    %22 = arith.mulf %19, %8 : vector<2x32xf32>
    %23 = arith.mulf %18, %20 : vector<2x32xf32>
    %24 = arith.addf %22, %23 : vector<2x32xf32>
    %25 = math.tanh %24 : vector<2x32xf32>
    %26 = arith.mulf %21, %25 : vector<2x32xf32>
    %27 = vector.extract_strided_slice %5 {offsets = [2, 0], sizes = [2, 128], strides = [1, 1]} : vector<16x128xf32> to vector<2x128xf32>
    %cst_11 = arith.constant dense<0.000000e+00> : vector<2x128xf32>
    %28 = tpu.matmul %26, %6, %cst_11 {dimension_numbers = #tpu.dot_dimension_numbers<[1], [0], [0], [1], [0, 0, 1, 1], [], []>} : vector<2x32xf32>, vector<32x128xf32>, vector<2x128xf32> -> vector<2x128xf32>
    %29 = arith.addf %27, %28 : vector<2x128xf32>
    %30 = arith.negf %29 : vector<2x128xf32>
    %31 = math.exp %30 : vector<2x128xf32>
    %cst_12 = arith.constant 1.000000e+00 : f32
    %32 = vector.broadcast %cst_12 : f32 to vector<2x128xf32>
    %33 = arith.addf %32, %31 : vector<2x128xf32>
    %34 = arith.divf %32, %33 : vector<2x128xf32>
    %35 = math.tanh %29 : vector<2x128xf32>
    %36 = vector.extract_strided_slice %34 {offsets = [0, 0], sizes = [2, 32], strides = [1, 1]} : vector<2x128xf32> to vector<2x32xf32>
    %37 = vector.extract_strided_slice %34 {offsets = [0, 32], sizes = [2, 32], strides = [1, 1]} : vector<2x128xf32> to vector<2x32xf32>
    %38 = vector.extract_strided_slice %35 {offsets = [0, 64], sizes = [2, 32], strides = [1, 1]} : vector<2x128xf32> to vector<2x32xf32>
    %39 = vector.extract_strided_slice %34 {offsets = [0, 96], sizes = [2, 32], strides = [1, 1]} : vector<2x128xf32> to vector<2x32xf32>
    %40 = arith.mulf %37, %24 : vector<2x32xf32>
    %41 = arith.mulf %36, %38 : vector<2x32xf32>
    %42 = arith.addf %40, %41 : vector<2x32xf32>
    %43 = math.tanh %42 : vector<2x32xf32>
    %44 = arith.mulf %39, %43 : vector<2x32xf32>
    %45 = vector.extract_strided_slice %5 {offsets = [4, 0], sizes = [2, 128], strides = [1, 1]} : vector<16x128xf32> to vector<2x128xf32>
    %cst_13 = arith.constant dense<0.000000e+00> : vector<2x128xf32>
    %46 = tpu.matmul %44, %6, %cst_13 {dimension_numbers = #tpu.dot_dimension_numbers<[1], [0], [0], [1], [0, 0, 1, 1], [], []>} : vector<2x32xf32>, vector<32x128xf32>, vector<2x128xf32> -> vector<2x128xf32>
    %47 = arith.addf %45, %46 : vector<2x128xf32>
    %48 = arith.negf %47 : vector<2x128xf32>
    %49 = math.exp %48 : vector<2x128xf32>
    %cst_14 = arith.constant 1.000000e+00 : f32
    %50 = vector.broadcast %cst_14 : f32 to vector<2x128xf32>
    %51 = arith.addf %50, %49 : vector<2x128xf32>
    %52 = arith.divf %50, %51 : vector<2x128xf32>
    %53 = math.tanh %47 : vector<2x128xf32>
    %54 = vector.extract_strided_slice %52 {offsets = [0, 0], sizes = [2, 32], strides = [1, 1]} : vector<2x128xf32> to vector<2x32xf32>
    %55 = vector.extract_strided_slice %52 {offsets = [0, 32], sizes = [2, 32], strides = [1, 1]} : vector<2x128xf32> to vector<2x32xf32>
    %56 = vector.extract_strided_slice %53 {offsets = [0, 64], sizes = [2, 32], strides = [1, 1]} : vector<2x128xf32> to vector<2x32xf32>
    %57 = vector.extract_strided_slice %52 {offsets = [0, 96], sizes = [2, 32], strides = [1, 1]} : vector<2x128xf32> to vector<2x32xf32>
    %58 = arith.mulf %55, %42 : vector<2x32xf32>
    %59 = arith.mulf %54, %56 : vector<2x32xf32>
    %60 = arith.addf %58, %59 : vector<2x32xf32>
    %61 = math.tanh %60 : vector<2x32xf32>
    %62 = arith.mulf %57, %61 : vector<2x32xf32>
    %63 = vector.extract_strided_slice %5 {offsets = [6, 0], sizes = [2, 128], strides = [1, 1]} : vector<16x128xf32> to vector<2x128xf32>
    %cst_15 = arith.constant dense<0.000000e+00> : vector<2x128xf32>
    %64 = tpu.matmul %62, %6, %cst_15 {dimension_numbers = #tpu.dot_dimension_numbers<[1], [0], [0], [1], [0, 0, 1, 1], [], []>} : vector<2x32xf32>, vector<32x128xf32>, vector<2x128xf32> -> vector<2x128xf32>
    %65 = arith.addf %63, %64 : vector<2x128xf32>
    %66 = arith.negf %65 : vector<2x128xf32>
    %67 = math.exp %66 : vector<2x128xf32>
    %cst_16 = arith.constant 1.000000e+00 : f32
    %68 = vector.broadcast %cst_16 : f32 to vector<2x128xf32>
    %69 = arith.addf %68, %67 : vector<2x128xf32>
    %70 = arith.divf %68, %69 : vector<2x128xf32>
    %71 = math.tanh %65 : vector<2x128xf32>
    %72 = vector.extract_strided_slice %70 {offsets = [0, 0], sizes = [2, 32], strides = [1, 1]} : vector<2x128xf32> to vector<2x32xf32>
    %73 = vector.extract_strided_slice %70 {offsets = [0, 32], sizes = [2, 32], strides = [1, 1]} : vector<2x128xf32> to vector<2x32xf32>
    %74 = vector.extract_strided_slice %71 {offsets = [0, 64], sizes = [2, 32], strides = [1, 1]} : vector<2x128xf32> to vector<2x32xf32>
    %75 = vector.extract_strided_slice %70 {offsets = [0, 96], sizes = [2, 32], strides = [1, 1]} : vector<2x128xf32> to vector<2x32xf32>
    %76 = arith.mulf %73, %60 : vector<2x32xf32>
    %77 = arith.mulf %72, %74 : vector<2x32xf32>
    %78 = arith.addf %76, %77 : vector<2x32xf32>
    %79 = math.tanh %78 : vector<2x32xf32>
    %80 = arith.mulf %75, %79 : vector<2x32xf32>
    %81 = vector.extract_strided_slice %5 {offsets = [8, 0], sizes = [2, 128], strides = [1, 1]} : vector<16x128xf32> to vector<2x128xf32>
    %cst_17 = arith.constant dense<0.000000e+00> : vector<2x128xf32>
    %82 = tpu.matmul %80, %6, %cst_17 {dimension_numbers = #tpu.dot_dimension_numbers<[1], [0], [0], [1], [0, 0, 1, 1], [], []>} : vector<2x32xf32>, vector<32x128xf32>, vector<2x128xf32> -> vector<2x128xf32>
    %83 = arith.addf %81, %82 : vector<2x128xf32>
    %84 = arith.negf %83 : vector<2x128xf32>
    %85 = math.exp %84 : vector<2x128xf32>
    %cst_18 = arith.constant 1.000000e+00 : f32
    %86 = vector.broadcast %cst_18 : f32 to vector<2x128xf32>
    %87 = arith.addf %86, %85 : vector<2x128xf32>
    %88 = arith.divf %86, %87 : vector<2x128xf32>
    %89 = math.tanh %83 : vector<2x128xf32>
    %90 = vector.extract_strided_slice %88 {offsets = [0, 0], sizes = [2, 32], strides = [1, 1]} : vector<2x128xf32> to vector<2x32xf32>
    %91 = vector.extract_strided_slice %88 {offsets = [0, 32], sizes = [2, 32], strides = [1, 1]} : vector<2x128xf32> to vector<2x32xf32>
    %92 = vector.extract_strided_slice %89 {offsets = [0, 64], sizes = [2, 32], strides = [1, 1]} : vector<2x128xf32> to vector<2x32xf32>
    %93 = vector.extract_strided_slice %88 {offsets = [0, 96], sizes = [2, 32], strides = [1, 1]} : vector<2x128xf32> to vector<2x32xf32>
    %94 = arith.mulf %91, %78 : vector<2x32xf32>
    %95 = arith.mulf %90, %92 : vector<2x32xf32>
    %96 = arith.addf %94, %95 : vector<2x32xf32>
    %97 = math.tanh %96 : vector<2x32xf32>
    %98 = arith.mulf %93, %97 : vector<2x32xf32>
    %99 = vector.extract_strided_slice %5 {offsets = [10, 0], sizes = [2, 128], strides = [1, 1]} : vector<16x128xf32> to vector<2x128xf32>
    %cst_19 = arith.constant dense<0.000000e+00> : vector<2x128xf32>
    %100 = tpu.matmul %98, %6, %cst_19 {dimension_numbers = #tpu.dot_dimension_numbers<[1], [0], [0], [1], [0, 0, 1, 1], [], []>} : vector<2x32xf32>, vector<32x128xf32>, vector<2x128xf32> -> vector<2x128xf32>
    %101 = arith.addf %99, %100 : vector<2x128xf32>
    %102 = arith.negf %101 : vector<2x128xf32>
    %103 = math.exp %102 : vector<2x128xf32>
    %cst_20 = arith.constant 1.000000e+00 : f32
    %104 = vector.broadcast %cst_20 : f32 to vector<2x128xf32>
    %105 = arith.addf %104, %103 : vector<2x128xf32>
    %106 = arith.divf %104, %105 : vector<2x128xf32>
    %107 = math.tanh %101 : vector<2x128xf32>
    %108 = vector.extract_strided_slice %106 {offsets = [0, 0], sizes = [2, 32], strides = [1, 1]} : vector<2x128xf32> to vector<2x32xf32>
    %109 = vector.extract_strided_slice %106 {offsets = [0, 32], sizes = [2, 32], strides = [1, 1]} : vector<2x128xf32> to vector<2x32xf32>
    %110 = vector.extract_strided_slice %107 {offsets = [0, 64], sizes = [2, 32], strides = [1, 1]} : vector<2x128xf32> to vector<2x32xf32>
    %111 = vector.extract_strided_slice %106 {offsets = [0, 96], sizes = [2, 32], strides = [1, 1]} : vector<2x128xf32> to vector<2x32xf32>
    %112 = arith.mulf %109, %96 : vector<2x32xf32>
    %113 = arith.mulf %108, %110 : vector<2x32xf32>
    %114 = arith.addf %112, %113 : vector<2x32xf32>
    %115 = math.tanh %114 : vector<2x32xf32>
    %116 = arith.mulf %111, %115 : vector<2x32xf32>
    %117 = vector.extract_strided_slice %5 {offsets = [12, 0], sizes = [2, 128], strides = [1, 1]} : vector<16x128xf32> to vector<2x128xf32>
    %cst_21 = arith.constant dense<0.000000e+00> : vector<2x128xf32>
    %118 = tpu.matmul %116, %6, %cst_21 {dimension_numbers = #tpu.dot_dimension_numbers<[1], [0], [0], [1], [0, 0, 1, 1], [], []>} : vector<2x32xf32>, vector<32x128xf32>, vector<2x128xf32> -> vector<2x128xf32>
    %119 = arith.addf %117, %118 : vector<2x128xf32>
    %120 = arith.negf %119 : vector<2x128xf32>
    %121 = math.exp %120 : vector<2x128xf32>
    %cst_22 = arith.constant 1.000000e+00 : f32
    %122 = vector.broadcast %cst_22 : f32 to vector<2x128xf32>
    %123 = arith.addf %122, %121 : vector<2x128xf32>
    %124 = arith.divf %122, %123 : vector<2x128xf32>
    %125 = math.tanh %119 : vector<2x128xf32>
    %126 = vector.extract_strided_slice %124 {offsets = [0, 0], sizes = [2, 32], strides = [1, 1]} : vector<2x128xf32> to vector<2x32xf32>
    %127 = vector.extract_strided_slice %124 {offsets = [0, 32], sizes = [2, 32], strides = [1, 1]} : vector<2x128xf32> to vector<2x32xf32>
    %128 = vector.extract_strided_slice %125 {offsets = [0, 64], sizes = [2, 32], strides = [1, 1]} : vector<2x128xf32> to vector<2x32xf32>
    %129 = vector.extract_strided_slice %124 {offsets = [0, 96], sizes = [2, 32], strides = [1, 1]} : vector<2x128xf32> to vector<2x32xf32>
    %130 = arith.mulf %127, %114 : vector<2x32xf32>
    %131 = arith.mulf %126, %128 : vector<2x32xf32>
    %132 = arith.addf %130, %131 : vector<2x32xf32>
    %133 = math.tanh %132 : vector<2x32xf32>
    %134 = arith.mulf %129, %133 : vector<2x32xf32>
    %135 = vector.extract_strided_slice %5 {offsets = [14, 0], sizes = [2, 128], strides = [1, 1]} : vector<16x128xf32> to vector<2x128xf32>
    %cst_23 = arith.constant dense<0.000000e+00> : vector<2x128xf32>
    %136 = tpu.matmul %134, %6, %cst_23 {dimension_numbers = #tpu.dot_dimension_numbers<[1], [0], [0], [1], [0, 0, 1, 1], [], []>} : vector<2x32xf32>, vector<32x128xf32>, vector<2x128xf32> -> vector<2x128xf32>
    %137 = arith.addf %135, %136 : vector<2x128xf32>
    %138 = arith.negf %137 : vector<2x128xf32>
    %139 = math.exp %138 : vector<2x128xf32>
    %cst_24 = arith.constant 1.000000e+00 : f32
    %140 = vector.broadcast %cst_24 : f32 to vector<2x128xf32>
    %141 = arith.addf %140, %139 : vector<2x128xf32>
    %142 = arith.divf %140, %141 : vector<2x128xf32>
    %143 = math.tanh %137 : vector<2x128xf32>
    %144 = vector.extract_strided_slice %142 {offsets = [0, 0], sizes = [2, 32], strides = [1, 1]} : vector<2x128xf32> to vector<2x32xf32>
    %145 = vector.extract_strided_slice %142 {offsets = [0, 32], sizes = [2, 32], strides = [1, 1]} : vector<2x128xf32> to vector<2x32xf32>
    %146 = vector.extract_strided_slice %143 {offsets = [0, 64], sizes = [2, 32], strides = [1, 1]} : vector<2x128xf32> to vector<2x32xf32>
    %147 = vector.extract_strided_slice %142 {offsets = [0, 96], sizes = [2, 32], strides = [1, 1]} : vector<2x128xf32> to vector<2x32xf32>
    %148 = arith.mulf %145, %132 : vector<2x32xf32>
    %149 = arith.mulf %144, %146 : vector<2x32xf32>
    %150 = arith.addf %148, %149 : vector<2x32xf32>
    %151 = math.tanh %150 : vector<2x32xf32>
    %152 = arith.mulf %147, %151 : vector<2x32xf32>
    %c0_25 = arith.constant 0 : index
    %c0_26 = arith.constant 0 : index
    %153 = vector.load %arg4[%c0_25, %c0_26] : memref<1x32xf32, #tpu.memory_space<vmem>>, vector<1x32xf32>
    %154 = vector.broadcast %153 : vector<1x32xf32> to vector<2x32xf32>
    %155 = arith.mulf %152, %154 : vector<2x32xf32>
    %cst_27 = arith.constant dense<0.000000e+00> : vector<2xf32>
    %156 = vector.multi_reduction <add>, %155, %cst_27 [1] : vector<2x32xf32> to vector<2xf32>
    %157 = vector.shape_cast %156 : vector<2xf32> to vector<2x1xf32>
    %c0_28 = arith.constant 0 : index
    %c0_29 = arith.constant 0 : index
    %158 = vector.load %arg5[%c0_28, %c0_29] : memref<1x1xf32, #tpu.memory_space<vmem>>, vector<1x1xf32>
    %159 = vector.broadcast %158 : vector<1x1xf32> to vector<2x1xf32>
    %160 = arith.addf %157, %159 : vector<2x1xf32>
    %161 = arith.negf %160 : vector<2x1xf32>
    %162 = math.exp %161 : vector<2x1xf32>
    %cst_30 = arith.constant 1.000000e+00 : f32
    %163 = vector.broadcast %cst_30 : f32 to vector<2x1xf32>
    %164 = arith.addf %163, %162 : vector<2x1xf32>
    %165 = arith.divf %163, %164 : vector<2x1xf32>
    %c0_31 = arith.constant 0 : index
    %c0_32 = arith.constant 0 : index
    %166 = vector.load %arg6[%c0_31, %c0_32] : memref<2x1xf32, #tpu.memory_space<vmem>>, vector<2x1xf32>
    tpu.vector_store %arg6[%c0_31, %c0_32], %165 {strides = array<i32>} : memref<2x1xf32, #tpu.memory_space<vmem>>, vector<2x1xf32>,
    return
  }
}

</mosaic_0001>

<bundles_post_ra>
// kernel: tpu_custom_call.1
= control target key start
LH: loop header
LB: loop body
LE: loop exit
PB: predicated region body
PF: predicated region fallthrough
CT: control target
= control target key end

     0   :  { %s1634_s0 = inlined_call_operand.hbm [shape: f32[16,32], index: 0, kind: input, shape index: {}]   ;;  %s1635_s1 = inlined_call_operand.hbm [shape: f32[32,128], index: 1, kind: input, shape index: {}]   ;;  %s1636_s2 = inlined_call_operand.hbm [shape: f32[32,128], index: 2, kind: input, shape index: {}]   ;;  %s1637_s3 = inlined_call_operand.vmem [shape: f32[1,128], index: 3, kind: input, shape index: {}]   ;;  %s1638_s4 = inlined_call_operand.vmem [shape: f32[1,32], index: 4, kind: input, shape index: {}]   ;;  %s1639_s5 = inlined_call_operand.<no memory space> [shape: f32[1,1], index: 5, kind: input, shape index: {}]   ;;  %s1640_s6 = inlined_call_operand.vmem [shape: f32[2,1], index: 6, kind: output, shape index: {}]  }
   0x1   :  { %v11_v0 = vstv %s1639_s5 }
   0x2   :  { %12 = vst [vmem:[#allocation2] sm:$0x1] %v11_v0 }
   0x3   :  { %13 = vsyncpa [#allocation4], 0 }
   0x4   :  { %14 = vsyncpa [#allocation6], 0  ;;  %s1418_s23 = smov [#allocation5]   ;;  %s1419_s25 = smov [#allocation3]  }
   0x5   :  { %s32_s24 = sshll.u32 %s1418_s23, 4  ;;  %s20_s26 = sshll.u32 %s1419_s25, 4  ;;  %s33_s24 = int_to_ptr.vmem [resolvable:$true] %s32_s24  ;;  %s1467_s26 = int_to_ptr.vmem [resolvable:$true] %s20_s26 }
   0x6   :  { %s1348_s29 = scalar_lea.hbm %s1635_s1, 512 }
   0x7   :  { %p1349_p0 = scmp.ne.s32.totalorder %s1635_s1, %s1348_s29  ;;  %p1352_p1 = scmp.lt.u32.totalorder %s1348_s29, %s1635_s1 }
   0x9   :  { %p1354_p2 = pnand %p1352_p1, %p1349_p0 }
   0xb   :  { %1357 = shalt.err (!%p1354_p2)
}
   0xc   :  { %s1358_s9 = scalar_lea.vmem %s33_s24, 512  ;;  %p1363_p4 = scmp.lt.s32.totalorder %s33_s24, %s33_s24 }
   0xd   :  { %p1359_p3 = scmp.ne.s32.totalorder %s33_s24, %s1358_s9  ;;  %p1364_p5 = scmp.lt.s32.totalorder %s1358_s9, %s1358_s9 }
   0xf   :  { %p1365_p6 = por %p1364_p5, %p1363_p4 }
  0x11   :  { %p1366_p7 = pnand %p1365_p6, %p1359_p3 }
  0x13   :  { %1369 = shalt.err (!%p1366_p7)
}
  0x14   :  { %s1420_s10 = smov 128   ;;  %s1421_s11 = smov 8  }
  0x15   :  { %38 = dma.hbm_to_vmem [thread:$0]  %s1635_s1, 512, %s33_s24, [#allocation6], %s1420_s10, %s1420_s10, %s1421_s11  }
  0x16   :  { %s1370_s16 = scalar_lea.hbm %s1634_s0, 256 }
  0x17   :  { %p1371_p8 = scmp.ne.s32.totalorder %s1634_s0, %s1370_s16  ;;  %p1374_p9 = scmp.lt.u32.totalorder %s1370_s16, %s1634_s0 }
  0x19   :  { %p1376_p10 = pnand %p1374_p9, %p1371_p8 }
  0x1b   :  { %1379 = shalt.err (!%p1376_p10)
}
  0x1c   :  { %s1380_s21 = scalar_lea.vmem %s1467_s26, 256  ;;  %p1385_p12 = scmp.lt.s32.totalorder %s1467_s26, %s1467_s26 }
  0x1d   :  { %p1381_p11 = scmp.ne.s32.totalorder %s1467_s26, %s1380_s21  ;;  %p1386_p13 = scmp.lt.s32.totalorder %s1380_s21, %s1380_s21 }
  0x1f   :  { %p1387_p0 = por %p1386_p13, %p1385_p12 }
  0x21   :  { %p1388_p1 = pnand %p1387_p0, %p1381_p11 }
  0x23   :  { %1391 = shalt.err (!%p1388_p1)
}
  0x24   :  { %26 = dma.hbm_to_vmem [thread:$0]  %s1634_s0, 256, %s1467_s26, [#allocation4], %s1420_s10, %s1420_s10, %s1421_s11  }
  0x25   :  { %s1422_s23 = smov [#allocation7]   ;;  %s1392_s28 = scalar_lea.hbm %s1636_s2, 512 }
  0x26   :  { %s44_s24 = sshll.u32 %s1422_s23, 4  ;;  %p1393_p2 = scmp.ne.s32.totalorder %s1636_s2, %s1392_s28  ;;  %s45_s24 = int_to_ptr.vmem [resolvable:$true] %s44_s24 }
  0x27   :  { %p1396_p3 = scmp.lt.u32.totalorder %s1392_s28, %s1636_s2 }
  0x29   :  { %p1398_p4 = pnand %p1396_p3, %p1393_p2 }
  0x2b   :  { %1401 = shalt.err (!%p1398_p4)
}
  0x2c   :  { %s1402_s5 = scalar_lea.vmem %s45_s24, 512  ;;  %p1407_p6 = scmp.lt.s32.totalorder %s45_s24, %s45_s24 }
  0x2d   :  { %p1403_p5 = scmp.ne.s32.totalorder %s45_s24, %s1402_s5  ;;  %p1408_p7 = scmp.lt.s32.totalorder %s1402_s5, %s1402_s5 }
  0x2f   :  { %p1409_p8 = por %p1408_p7, %p1407_p6 }
  0x31   :  { %p1410_p9 = pnand %p1409_p8, %p1403_p5 }
  0x33   :  { %1413 = shalt.err (!%p1410_p9)
}
  0x34   :  { %50 = dma.hbm_to_vmem [thread:$0]  %s1636_s2, 512, %s45_s24, [#allocation6], %s1420_s10, %s1420_s10, %s1421_s11  }
  0x35   :  { %1414 = dma.done.wait [#allocation4], 256  }
  0x36   :  { %1415 = vsyncadd [#allocation4], 4294967040 }
  0x37   :  { %1416 = dma.done.wait [#allocation6], 1024  }
  0x38   :  { %1417 = vsyncadd [#allocation6], 4294966272  ;;  %v1423_v1 = vmov 0.0|0.0   ;;  %vm1424_vm0 = vmmov 0   ;;  %v1425_v2 = vmov 0.0   ;;  %v68_v3 = vld [vmem:[#allocation5] sm:$0xff] }
  0x39   :  { %1221 = vmatprep.subr.bf16.mxu1 %v1423_v1  ;;  %1133 = vmatprep.mubr.msk.f32.mxu1 %vm1424_vm0, %v1425_v2  ;;  %v69_v4 = vld [vmem:[#allocation5 + $0x8] sm:$0xff]  ;;  %v161_v5 = vld [vmem:[#allocation7] sm:$0xff]  ;;  %vm79_vm1 = vcmask 261120   ;;  %v70_v8 = vld [vmem:[#allocation5 + $0x10] sm:$0xff]  ;;  %s1426_s10 = smov 64   ;;  %s1428_s13 = smov 96  }
  0x3a   :  { %v1213_v6 = vpack.c.bf16 %v69_v4, %v68_v3  ;;  %v162_v7 = vld [vmem:[#allocation7 + $0x8] sm:$0xff]  ;;  %v71_v9 = vld [vmem:[#allocation5 + $0x18] sm:$0xff]  ;;  %v66_v12 = vld [vmem:[#allocation3] sm:$0xff]  ;;  %vm1021_vm2 = vcmask 261126   ;;  %vm1039_vm3 = vcmask 7174  }
  0x3b   :  { %v1522_v10 = vpack.c.bf16 %v162_v7, %v161_v5  ;;  %v1217_v11 = vpack.c.bf16 %v71_v9, %v70_v8  ;;  %v163_v13 = vld [vmem:[#allocation7 + $0x10] sm:$0xff]  ;;  %v164_v14 = vld [vmem:[#allocation7 + $0x18] sm:$0xff]  ;;  %1122 = vmatprep.mubr.msk.f32.mxu0 %vm79_vm1, %v66_v12  ;;  %v1047_v17 = vld [vmem:[%s1637_s3] ss:$0 sm:$0xff]  ;;  %s1427_s3 = smov 32  }
  0x3c   :  { %1214 = vmatprep.subr.bf16.mxu0 %v1213_v6  ;;  %v1526_v15 = vpack.c.bf16 %v164_v14, %v163_v13  ;;  %v67_v16 = vld [vmem:[#allocation3 + $0x8] sm:$0xff] }
  0x3d   :  { %1216 = vmatpush3.bf16.msra.mxu0 %v1213_v6  ;;  %1223 = vmatpush3.bf16.msra.mxu1 %v1522_v10 }
  0x3e   :  { %1218 = vmatprep.subr.bf16.mxu0 %v1217_v11  ;;  %1224 = vmatprep.subr.bf16.mxu1 %v1423_v1 }
  0x41   :  { %1220 = vmatpush3.bf16.msra.mxu0 %v1217_v11  ;;  %1226 = vmatpush3.bf16.msra.mxu1 %v1526_v15 }
  0x42   :  { %1227 = vmatprep.subr.bf16.mxu0 %v1423_v1  ;;  %1233 = vmatprep.subr.bf16.mxu1 %v1423_v1 }
  0x44   :  { %1123 = vmatmul.mubr.msk.f32.vlgmr.msra.gmra.mrb[0].mxu0 %vm79_vm1, %v67_v16  ;;  %1134 = vmatmul.mubr.f32.vlgmr.msra.gmra.mrb[0].mxu1 %v1425_v2 }
  0x45   :  { %1229 = vmatpush3.bf16.msra.mxu0 %v1522_v10  ;;  %1144 = vmatprep.mubr.msk.f32.mxu0 %vm1424_vm0, %v1425_v2 }
  0x46   :  { %1230 = vmatprep.subr.bf16.mxu0 %v1423_v1  ;;  %1235 = vmatpush3.bf16.msra.mxu1 %v1522_v10 }
  0x47   :  { %1236 = vmatprep.subr.bf16.mxu1 %v1423_v1  ;;  %1155 = vmatprep.mubr.msk.f32.mxu1 %vm1424_vm0, %v1425_v2 }
  0x49   :  { %1232 = vmatpush3.bf16.msra.mxu0 %v1526_v15 }
  0x4a   :  { %1238 = vmatpush3.bf16.msra.mxu1 %v1526_v15  ;;  %1239 = vmatprep.subr.bf16.mxu0 %v1423_v1 }
  0x4b   :  { %1245 = vmatprep.subr.bf16.mxu1 %v1423_v1 }
 0x117   :  { %v1124_v18 = vpop.f32.mrb[0].mxu0  ;;  %v234_v19 = vpop.f32.mrb[0].mxu1 }
 0x118   :  { %v1549_v20 = vadd.f32 %v1124_v18, %v1047_v17  ;;  %v152_v21 = vpop.f32.mrb[1].mxu0  ;;  %v1135_v22 = vpop.f32.mrb[1].mxu1 }
 0x119   :  { %v1551_v23 = vadd.f32 %v1047_v17, %v152_v21 }
 0x11b   :  { %v238_v24 = vadd.f32 %v234_v19, %v1551_v23 }
 0x11d   :  { %1280 = vtanh.f32 %v238_v24  ;;  %v1050_v26 = vmul.f32 -1.442695, %v238_v24 }
 0x11f   :  { %1282 = vpow2.f32 %v1050_v26 }
 0x127   :  { %v1281_v25 = vpop.eup %1280 }
 0x128   :  { %248 = vrot.lane.b32.xlu0 %v1281_v25, %s1426_s10 }
 0x129   :  { %v1283_v27 = vpop.eup %1282 }
 0x12a   :  { %v242_v28 = vadd.f32 1.0, %v1283_v27 }
 0x12c   :  { %1284 = vrcp.f32 %v242_v28 }
 0x136   :  { %v1285_v29 = vpop.eup %1284 }
 0x137   :  { %v246_v32 = vmul.f32 0.0, %v1285_v29 }
 0x19a   :  { %v249_v30 = vpop.permute.xlu0 %248 }
 0x19b   :  { %v251_v31 = vmul.f32 %v1285_v29, %v249_v30 }
 0x19d   :  { %253 = vrot.lane.b32.xlu0 %v251_v31, %s1427_s3 }
 0x20f   :  { %v254_v33 = vpop.permute.xlu0 %253 }
 0x210   :  { %v256_v34 = vadd.f32 %v254_v33, %v246_v32 }
 0x212   :  { %1286 = vtanh.f32 %v256_v34  ;;  %v350_v50 = vrot.slane %v256_v34, 6 }
 0x21c   :  { %v1287_v35 = vpop.eup %1286 }
 0x21d   :  { %259 = vrot.lane.b32.xlu1 %v1287_v35, %s1426_s10 }
 0x28f   :  { %v260_v36 = vpop.permute.xlu1 %259 }
 0x290   :  { %v262_v37 = vmul.f32 %v1285_v29, %v260_v36 }
 0x292   :  { %264 = vrot.lane.b32.xlu1 %v262_v37, %s1427_s3 }
 0x304   :  { %v265_v38 = vpop.permute.xlu1 %264 }
 0x305   :  { %1145 = vmatmul.mubr.msk.f32.vlgmr.msra.gmra.mrb[2].mxu0 %vm79_vm1, %v265_v38 }
 0x306   :  { %1241 = vmatpush3.bf16.msra.mxu0 %v1522_v10  ;;  %1166 = vmatprep.mubr.msk.f32.mxu0 %vm1424_vm0, %v1425_v2 }
 0x307   :  { %1242 = vmatprep.subr.bf16.mxu0 %v1423_v1 }
 0x30a   :  { %1244 = vmatpush3.bf16.msra.mxu0 %v1526_v15 }
 0x30b   :  { %1251 = vmatprep.subr.bf16.mxu0 %v1423_v1 }
 0x3d8   :  { %v334_v39 = vpop.f32.mrb[2].mxu0 }
 0x3d9   :  { %v339_v40 = vrot.slane %v334_v39, 6  ;;  %v1146_v41 = vpop.f32.mrb[3].mxu0 }
 0x3db   :  { %v341_v42 = vadd.f32 %v339_v40, %v1551_v23 }
 0x3dd   :  { %1288 = vtanh.f32 %v341_v42  ;;  %v1052_v44 = vmul.f32 -1.442695, %v341_v42 }
 0x3df   :  { %1290 = vpow2.f32 %v1052_v44 }
 0x3e7   :  { %v1289_v43 = vpop.eup %1288 }
 0x3e8   :  { %354 = vrot.lane.b32.xlu0 %v1289_v43, %s1426_s10 }
 0x3e9   :  { %v1291_v45 = vpop.eup %1290 }
 0x3ea   :  { %v345_v46 = vadd.f32 1.0, %v1291_v45 }
 0x3ec   :  { %1292 = vrcp.f32 %v345_v46 }
 0x3f6   :  { %v1293_v47 = vpop.eup %1292 }
 0x3f7   :  { %v352_v51 = vmul.f32 %v1293_v47, %v350_v50 }
 0x45a   :  { %v355_v48 = vpop.permute.xlu0 %354 }
 0x45b   :  { %v357_v49 = vmul.f32 %v1293_v47, %v355_v48 }
 0x45d   :  { %359 = vrot.lane.b32.xlu1 %v357_v49, %s1427_s3 }
 0x4cf   :  { %v360_v52 = vpop.permute.xlu1 %359 }
 0x4d0   :  { %v362_v53 = vadd.f32 %v360_v52, %v352_v51 }
 0x4d2   :  { %1294 = vtanh.f32 %v362_v53  ;;  %v457_v8 = vrot.slane %v362_v53, 6 }
 0x4dc   :  { %v1295_v54 = vpop.eup %1294 }
 0x4dd   :  { %365 = vrot.lane.b32.xlu0 %v1295_v54, %s1426_s10 }
 0x54f   :  { %v366_v55 = vpop.permute.xlu0 %365 }
 0x550   :  { %v368_v56 = vmul.f32 %v1293_v47, %v366_v55 }
 0x552   :  { %v370_v57 = vrot.slane %v368_v56, 2 }
 0x554   :  { %371 = vrot.lane.b32.xlu1 %v370_v57, %s1427_s3 }
 0x5c6   :  { %v372_v58 = vpop.permute.xlu1 %371 }
 0x5c7   :  { %1156 = vmatmul.mubr.msk.f32.vlgmr.msra.gmra.mrb[2].mxu1 %vm79_vm1, %v372_v58 }
 0x5c8   :  { %1247 = vmatpush3.bf16.msra.mxu1 %v1522_v10  ;;  %1177 = vmatprep.mubr.msk.f32.mxu1 %vm1424_vm0, %v1425_v2 }
 0x5c9   :  { %1248 = vmatprep.subr.bf16.mxu1 %v1423_v1 }
 0x5cc   :  { %1250 = vmatpush3.bf16.msra.mxu1 %v1526_v15 }
 0x5cd   :  { %1257 = vmatprep.subr.bf16.mxu1 %v1423_v1 }
 0x69a   :  { %v441_v59 = vpop.f32.mrb[2].mxu1 }
 0x69b   :  { %v446_v60 = vrot.slane %v441_v59, 4  ;;  %v1157_v61 = vpop.f32.mrb[3].mxu1 }
 0x69d   :  { %v448_v62 = vadd.f32 %v446_v60, %v1551_v23 }
 0x69f   :  { %1296 = vtanh.f32 %v448_v62  ;;  %v1054_v0 = vmul.f32 -1.442695, %v448_v62 }
 0x6a1   :  { %1298 = vpow2.f32 %v1054_v0 }
 0x6a9   :  { %v1297_v63 = vpop.eup %1296 }
 0x6aa   :  { %461 = vrot.lane.b32.xlu0 %v1297_v63, %s1426_s10 }
 0x6ab   :  { %v1299_v3 = vpop.eup %1298 }
 0x6ac   :  { %v452_v4 = vadd.f32 1.0, %v1299_v3 }
 0x6ae   :  { %1300 = vrcp.f32 %v452_v4 }
 0x6b8   :  { %v1301_v5 = vpop.eup %1300 }
 0x6b9   :  { %v459_v9 = vmul.f32 %v1301_v5, %v457_v8 }
 0x71c   :  { %v462_v6 = vpop.permute.xlu0 %461 }
 0x71d   :  { %v464_v7 = vmul.f32 %v1301_v5, %v462_v6 }
 0x71f   :  { %466 = vrot.lane.b32.xlu1 %v464_v7, %s1427_s3 }
 0x791   :  { %v467_v11 = vpop.permute.xlu1 %466 }
 0x792   :  { %v469_v12 = vadd.f32 %v467_v11, %v459_v9 }
 0x794   :  { %1302 = vtanh.f32 %v469_v12  ;;  %v564_v32 = vrot.slane %v469_v12, 6 }
 0x79e   :  { %v1303_v13 = vpop.eup %1302 }
 0x79f   :  { %472 = vrot.lane.b32.xlu0 %v1303_v13, %s1426_s10 }
 0x811   :  { %v473_v14 = vpop.permute.xlu0 %472 }
 0x812   :  { %v475_v16 = vmul.f32 %v1301_v5, %v473_v14 }
 0x814   :  { %v477_v17 = vrot.slane %v475_v16, 4 }
 0x816   :  { %478 = vrot.lane.b32.xlu1 %v477_v17, %s1427_s3 }
 0x888   :  { %v479_v18 = vpop.permute.xlu1 %478 }
 0x889   :  { %1167 = vmatmul.mubr.msk.f32.vlgmr.msra.gmra.mrb[4].mxu0 %vm79_vm1, %v479_v18 }
 0x88a   :  { %1253 = vmatpush3.bf16.msra.mxu0 %v1522_v10  ;;  %1188 = vmatprep.mubr.msk.f32.mxu0 %vm1424_vm0, %v1425_v2 }
 0x88b   :  { %1254 = vmatprep.subr.bf16.mxu0 %v1423_v1 }
 0x88e   :  { %1256 = vmatpush3.bf16.msra.mxu0 %v1526_v15 }
 0x88f   :  { %1263 = vmatprep.subr.bf16.mxu0 %v1423_v1 }
 0x95c   :  { %v548_v19 = vpop.f32.mrb[4].mxu0 }
 0x95d   :  { %v553_v21 = vrot.slane %v548_v19, 2  ;;  %v1168_v22 = vpop.f32.mrb[5].mxu0 }
 0x95f   :  { %v555_v24 = vadd.f32 %v553_v21, %v1551_v23 }
 0x961   :  { %1304 = vtanh.f32 %v555_v24  ;;  %v1056_v26 = vmul.f32 -1.442695, %v555_v24 }
 0x963   :  { %1306 = vpow2.f32 %v1056_v26 }
 0x96b   :  { %v1305_v25 = vpop.eup %1304 }
 0x96c   :  { %568 = vrot.lane.b32.xlu0 %v1305_v25, %s1426_s10 }
 0x96d   :  { %v1307_v27 = vpop.eup %1306 }
 0x96e   :  { %v559_v28 = vadd.f32 1.0, %v1307_v27 }
 0x970   :  { %1308 = vrcp.f32 %v559_v28 }
 0x97a   :  { %v1309_v29 = vpop.eup %1308 }
 0x97b   :  { %v566_v33 = vmul.f32 %v1309_v29, %v564_v32 }
 0x9de   :  { %v569_v30 = vpop.permute.xlu0 %568 }
 0x9df   :  { %v571_v31 = vmul.f32 %v1309_v29, %v569_v30 }
 0x9e1   :  { %573 = vrot.lane.b32.xlu1 %v571_v31, %s1427_s3 }
 0xa53   :  { %v574_v34 = vpop.permute.xlu1 %573 }
 0xa54   :  { %v576_v35 = vadd.f32 %v574_v34, %v566_v33 }
 0xa56   :  { %1310 = vtanh.f32 %v576_v35  ;;  %v668_v50 = vrot.slane %v576_v35, 6 }
 0xa60   :  { %v1311_v23 = vpop.eup %1310 }
 0xa61   :  { %579 = vrot.lane.b32.xlu0 %v1311_v23, %s1426_s10 }
 0xad3   :  { %v580_v36 = vpop.permute.xlu0 %579 }
 0xad4   :  { %v582_v37 = vmul.f32 %v1309_v29, %v580_v36 }
 0xad6   :  { %v584_v38 = vrot.slane %v582_v37, 6 }
 0xad8   :  { %585 = vrot.lane.b32.xlu1 %v584_v38, %s1427_s3 }
 0xb4a   :  { %v586_v39 = vpop.permute.xlu1 %585 }
 0xb4b   :  { %1178 = vmatmul.mubr.msk.f32.vlgmr.msra.gmra.mrb[4].mxu1 %vm79_vm1, %v586_v39 }
 0xb4c   :  { %1259 = vmatpush3.bf16.msra.mxu1 %v1522_v10  ;;  %1199 = vmatprep.mubr.msk.f32.mxu1 %vm1424_vm0, %v1425_v2 }
 0xb4d   :  { %1260 = vmatprep.subr.bf16.mxu1 %v1423_v1 }
 0xb50   :  { %1262 = vmatpush3.bf16.msra.mxu1 %v1526_v15 }
 0xc1e   :  { %v655_v40 = vpop.f32.mrb[4].mxu1 }
 0xc1f   :  { %v659_v41 = vadd.f32 %v655_v40, %v1549_v20  ;;  %v1179_v42 = vpop.f32.mrb[5].mxu1 }
 0xc21   :  { %1312 = vtanh.f32 %v659_v41  ;;  %v1058_v44 = vmul.f32 -1.442695, %v659_v41 }
 0xc23   :  { %1314 = vpow2.f32 %v1058_v44 }
 0xc2b   :  { %v1313_v43 = vpop.eup %1312 }
 0xc2c   :  { %672 = vrot.lane.b32.xlu0 %v1313_v43, %s1426_s10 }
 0xc2d   :  { %v1315_v45 = vpop.eup %1314 }
 0xc2e   :  { %v663_v46 = vadd.f32 1.0, %v1315_v45 }
 0xc30   :  { %1316 = vrcp.f32 %v663_v46  ;;  %v1065_v46 = vld [vmem:[%s1638_s4] ss:$0 sm:$0xff] }
 0xc3a   :  { %v1317_v47 = vpop.eup %1316 }
 0xc3b   :  { %v670_v51 = vmul.f32 %v1317_v47, %v668_v50 }
 0xc9e   :  { %v673_v48 = vpop.permute.xlu0 %672 }
 0xc9f   :  { %v675_v49 = vmul.f32 %v1317_v47, %v673_v48 }
 0xca1   :  { %677 = vrot.lane.b32.xlu1 %v675_v49, %s1427_s3 }
 0xd13   :  { %v678_v52 = vpop.permute.xlu1 %677 }
 0xd14   :  { %v680_v53 = vadd.f32 %v678_v52, %v670_v51 }
 0xd16   :  { %1318 = vtanh.f32 %v680_v53 }
 0xd20   :  { %v1319_v54 = vpop.eup %1318 }
 0xd21   :  { %683 = vrot.lane.b32.xlu0 %v1319_v54, %s1426_s10 }
 0xd93   :  { %v684_v55 = vpop.permute.xlu0 %683 }
 0xd94   :  { %v686_v56 = vmul.f32 %v1317_v47, %v684_v55 }
 0xd96   :  { %688 = vrot.lane.b32.xlu1 %v686_v56, %s1427_s3 }
 0xe08   :  { %v689_v57 = vpop.permute.xlu1 %688 }
 0xe09   :  { %1189 = vmatmul.mubr.msk.f32.vlgmr.msra.gmra.mrb[6].mxu0 %vm79_vm1, %v689_v57  ;;  %v1066_v57 = vld [vmem:[#allocation2] ss:$0 sm:$0xff] }
 0xe0a   :  { %1265 = vmatpush3.bf16.msra.mxu0 %v1522_v10  ;;  %1210 = vmatprep.mubr.msk.f32.mxu0 %vm1424_vm0, %v1425_v2 }
 0xe0b   :  { %1266 = vmatprep.subr.bf16.mxu0 %v1423_v1  ;;  %v774_v1 = vrot.slane %v680_v53, 6 }
 0xe0e   :  { %1268 = vmatpush3.bf16.msra.mxu0 %v1526_v15 }
 0xedc   :  { %v758_v58 = vpop.f32.mrb[6].mxu0 }
 0xedd   :  { %v763_v59 = vrot.slane %v758_v58, 6  ;;  %v1190_v60 = vpop.f32.mrb[7].mxu0 }
 0xedf   :  { %v765_v61 = vadd.f32 %v763_v59, %v1549_v20 }
 0xee1   :  { %1320 = vtanh.f32 %v765_v61  ;;  %v1060_v63 = vmul.f32 -1.442695, %v765_v61 }
 0xee3   :  { %1322 = vpow2.f32 %v1060_v63 }
 0xeeb   :  { %v1321_v62 = vpop.eup %1320 }
 0xeec   :  { %778 = vrot.lane.b32.xlu0 %v1321_v62, %s1426_s10 }
 0xeed   :  { %v1323_v0 = vpop.eup %1322 }
 0xeee   :  { %v769_v10 = vadd.f32 1.0, %v1323_v0 }
 0xef0   :  { %1324 = vrcp.f32 %v769_v10 }
 0xefa   :  { %v1325_v3 = vpop.eup %1324 }
 0xefb   :  { %v776_v15 = vmul.f32 %v1325_v3, %v774_v1 }
 0xf5e   :  { %v779_v2 = vpop.permute.xlu0 %778 }
 0xf5f   :  { %v781_v4 = vmul.f32 %v1325_v3, %v779_v2 }
 0xf61   :  { %783 = vrot.lane.b32.xlu1 %v781_v4, %s1427_s3 }
 0xfd3   :  { %v784_v5 = vpop.permute.xlu1 %783 }
 0xfd4   :  { %v786_v6 = vadd.f32 %v784_v5, %v776_v15 }
 0xfd6   :  { %1326 = vtanh.f32 %v786_v6  ;;  %v881_v27 = vrot.slane %v786_v6, 6 }
 0xfe0   :  { %v1327_v7 = vpop.eup %1326 }
 0xfe1   :  { %789 = vrot.lane.b32.xlu0 %v1327_v7, %s1426_s10 }
0x1053   :  { %v790_v8 = vpop.permute.xlu0 %789 }
0x1054   :  { %v792_v9 = vmul.f32 %v1325_v3, %v790_v8 }
0x1056   :  { %v794_v11 = vrot.slane %v792_v9, 2 }
0x1058   :  { %795 = vrot.lane.b32.xlu1 %v794_v11, %s1427_s3 }
0x10ca   :  { %v796_v12 = vpop.permute.xlu1 %795 }
0x10cb   :  { %1200 = vmatmul.mubr.msk.f32.vlgmr.msra.gmra.mrb[6].mxu1 %vm79_vm1, %v796_v12 }
0x119e   :  { %v865_v13 = vpop.f32.mrb[6].mxu1 }
0x119f   :  { %v870_v14 = vrot.slane %v865_v13, 4  ;;  %v1201_v16 = vpop.f32.mrb[7].mxu1 }
0x11a1   :  { %v872_v17 = vadd.f32 %v870_v14, %v1549_v20 }
0x11a3   :  { %1328 = vtanh.f32 %v872_v17  ;;  %v1062_v19 = vmul.f32 -1.442695, %v872_v17 }
0x11a5   :  { %1330 = vpow2.f32 %v1062_v19 }
0x11ad   :  { %v1329_v18 = vpop.eup %1328 }
0x11ae   :  { %885 = vrot.lane.b32.xlu0 %v1329_v18, %s1426_s10 }
0x11af   :  { %v1331_v21 = vpop.eup %1330 }
0x11b0   :  { %v876_v22 = vadd.f32 1.0, %v1331_v21 }
0x11b2   :  { %1332 = vrcp.f32 %v876_v22 }
0x11bc   :  { %v1333_v24 = vpop.eup %1332 }
0x11bd   :  { %v883_v28 = vmul.f32 %v1333_v24, %v881_v27 }
0x1220   :  { %v886_v25 = vpop.permute.xlu0 %885 }
0x1221   :  { %v888_v26 = vmul.f32 %v1333_v24, %v886_v25 }
0x1223   :  { %890 = vrot.lane.b32.xlu1 %v888_v26, %s1427_s3 }
0x1295   :  { %v891_v29 = vpop.permute.xlu1 %890 }
0x1296   :  { %v893_v30 = vadd.f32 %v891_v29, %v883_v28 }
0x1298   :  { %1334 = vtanh.f32 %v893_v30 }
0x12a2   :  { %v1335_v31 = vpop.eup %1334 }
0x12a3   :  { %896 = vrot.lane.b32.xlu0 %v1335_v31, %s1426_s10 }
0x1315   :  { %v897_v32 = vpop.permute.xlu0 %896 }
0x1316   :  { %v899_v33 = vmul.f32 %v1333_v24, %v897_v32 }
0x1318   :  { %v901_v34 = vrot.slane %v899_v33, 4 }
0x131a   :  { %902 = vrot.lane.b32.xlu1 %v901_v34, %s1427_s3 }
0x138c   :  { %v903_v35 = vpop.permute.xlu1 %902 }
0x138d   :  { %1211 = vmatmul.mubr.msk.f32.vlgmr.msra.gmra.mrb[8].mxu0 %vm79_vm1, %v903_v35 }
0x1460   :  { %v972_v23 = vpop.f32.mrb[8].mxu0 }
0x1461   :  { %v977_v36 = vrot.slane %v972_v23, 2  ;;  %v1212_v37 = vpop.f32.mrb[9].mxu0 }
0x1463   :  { %v979_v38 = vadd.f32 %v977_v36, %v1549_v20  ;;  %v988_v20 = vrot.slane %v893_v30, 6 }
0x1465   :  { %1336 = vtanh.f32 %v979_v38  ;;  %v1064_v40 = vmul.f32 -1.442695, %v979_v38 }
0x1467   :  { %1338 = vpow2.f32 %v1064_v40 }
0x146f   :  { %v1337_v39 = vpop.eup %1336 }
0x1470   :  { %992 = vrot.lane.b32.xlu0 %v1337_v39, %s1426_s10 }
0x1471   :  { %v1339_v41 = vpop.eup %1338 }
0x1472   :  { %v983_v42 = vadd.f32 1.0, %v1339_v41 }
0x1474   :  { %1340 = vrcp.f32 %v983_v42 }
0x147e   :  { %v1341_v43 = vpop.eup %1340 }
0x147f   :  { %v990_v47 = vmul.f32 %v1341_v43, %v988_v20 }
0x14e2   :  { %v993_v44 = vpop.permute.xlu0 %992 }
0x14e3   :  { %v995_v45 = vmul.f32 %v1341_v43, %v993_v44 }
0x14e5   :  { %997 = vrot.lane.b32.xlu1 %v995_v45, %s1427_s3 }
0x14e9   :  { %1013 = vrot.lane.b32.xlu1 %v1065_v46, %s1428_s13 }
0x1557   :  { %v998_v48 = vpop.permute.xlu1 %997 }
0x1558   :  { %v1000_v49 = vadd.f32 %v998_v48, %v990_v47 }
0x155a   :  { %1342 = vtanh.f32 %v1000_v49 }
0x155b   :  { %v1014_v52 = vpop.permute.xlu1 %1013 }
0x1564   :  { %v1343_v50 = vpop.eup %1342 }
0x1565   :  { %1003 = vrot.lane.b32.xlu0 %v1343_v50, %s1426_s10 }
0x15d7   :  { %v1004_v51 = vpop.permute.xlu0 %1003 }
0x15d8   :  { %v1006_v53 = vmul.f32 %v1341_v43, %v1004_v51 }
0x15da   :  { %v1016_v54 = vmul.f32 %v1014_v52, %v1006_v53 }
0x15dc   :  { %1018 = vrot.lane.b32.xlu0 %v1016_v54, %s1427_s3 }
0x164e   :  { %v1019_v55 = vpop.permute.xlu0 %1018 }
0x164f   :  { %v1022_v56 = vsel %vm1021_vm2, %v1019_v55, 0.0 }
0x1650   :  { %1023 = vadd.xlane.f32.xlu1 %v1022_v56 }
0x16dd   :  { %v1024_v58 = vpop.xlane.xlu1 %1023 }
0x16de   :  { %v1032_v59 = vadd.f32 %v1066_v57, %v1024_v58 }
0x16e0   :  { %v1067_v60 = vmul.f32 -1.442695, %v1032_v59 }
0x16e2   :  { %1344 = vpow2.f32 %v1067_v60 }
0x16ec   :  { %v1345_v61 = vpop.eup %1344 }
0x16ed   :  { %v1036_v62 = vadd.f32 1.0, %v1345_v61 }
0x16ef   :  { %1346 = vrcp.f32 %v1036_v62 }
0x16f9   :  { %v1347_v63 = vpop.eup %1346 }
0x16fa   :  { %1040 = vst.msk [vmem:[%s1640_s6 - $0x6] sm:$0xc0] %vm1039_vm3, %v1347_v63 }
0x16fb   :  { %1045 = vsyncpa [#allocation4], 1 }
0x16fc   :  { %1046 = vsyncpa [#allocation6], 1 }

</bundles_post_ra>
